<compile_context>
chip_gen: v6e
topology: v6e:2x2x1
jax: 0.10.0
libtpu: 0.0.40
codegen_flags: <defaults>
</compile_context>

<pallas_src>
import jax
import jax.numpy as jnp
from jax.experimental import pallas as pl
from jax.experimental.pallas import tpu as pltpu


def _round_up(v, m):
    return ((v + m - 1) // m) * m


def _cdiv(a, b):
    return (a + b - 1) // b


def _vmem_limit_bytes():
    """Generation-aware scoped-VMEM limit (v5e/v6e: 128 MiB phys, v7x: 64 MiB)."""
    try:
        cap = int(pltpu.get_tpu_info().vmem_capacity_bytes)
    except Exception:
        cap = 64 * 1024 * 1024
    if cap <= 0:
        cap = 64 * 1024 * 1024
    return min(int(cap * 0.7), 96 * 1024 * 1024)


def _choose_tl(cp, to, n_taps, halo, out_len, n_batch, budget_bytes):
    """Largest multiple-of-128 L tile that fits the VMEM budget.

    Per-TL-unit cost: halo'd bf16 input window (double buffered) + f32 output tile
    (double buffered) + in-kernel f32 accumulator + one bf16 tap slab.
    """
    per = 2 * 2 * cp + 2 * 4 * to + 4 * to + 2 * cp
    const = 2 * n_taps * to * cp * 2 + 2 * cp * halo * 2
    avail = max(budget_bytes - const, per * 128)
    tl = max(128, (avail // per) // 128 * 128)
    tl = min(tl, _round_up(out_len, 128))
    if n_batch == 1 and out_len > 128:
        # Guarantee >=2 grid steps along a parallel axis (v7x has 2 TensorCores).
        tl = min(tl, max(128, _round_up(_cdiv(out_len, 2), 128)))
    return tl


# ----------------------------- Pallas kernel -------------------------------

def _make_tap_kernel(tap_offsets, tl):
    n_taps = len(tap_offsets)

    def kernel(scale_ref, w_ref, x_ref, o_ref):
        # scale_ref: (1,)              f32  SMEM   (x_delta * w_delta)
        # w_ref:     (T, TO, Cp)       bf16 VMEM   (per-tap weight slabs, resident)
        # x_ref:     (1, 1, Cp, TLs)   bf16 VMEM   (halo'd input window of this L tile)
        # o_ref:     (1, TO, TL)       f32  VMEM   (lane-dense along L)
        window = x_ref[0, 0]                                    # (Cp, TLs)
        acc = jnp.zeros(o_ref.shape[1:], dtype=jnp.float32)
        for t in range(n_taps):                                 # static unroll, T = kh*kw
            d = tap_offsets[t]
            xs = window[:, d:d + tl]                            # static slice -> (Cp, TL)
            acc = acc + jnp.dot(w_ref[t], xs, preferred_element_type=jnp.float32)
        o_ref[0] = acc * scale_ref[0]

    return kernel


def systolic_tap_matmul(w_taps, x_flat, scale, tap_offsets, out_len):
    """out[n, o, g] = scale * sum_t w_taps[t, o, :] . x_flat[n, :, g + tap_offsets[t]]

    w_taps: (T, O, C) quantized integer weights; x_flat: (N, C, F) quantized, padded,
    flattened activations. Returns (N, O, out_len) float32.
    """
    n_taps, o_dim, c_dim = w_taps.shape
    n_batch, c_dim2, f_len = x_flat.shape
    assert c_dim2 == c_dim and len(tap_offsets) == n_taps

    cp = _round_up(max(c_dim, 8), 8)
    op = _round_up(max(o_dim, 8), 8)
    if op > 512:                          # tile O for large layers
        to = 256
        op = _round_up(op, to)
    else:
        to = op
    num_o = op // to

    max_d = int(max(tap_offsets))
    halo = _round_up(max_d, 128) if max_d > 0 else 0

    vmem_limit = _vmem_limit_bytes()
    tl = _choose_tl(cp, to, n_taps, halo, out_len, n_batch, vmem_limit // 2)
    lwp = _round_up(out_len, tl)
    num_l = lwp // tl
    tls = tl + halo
    flp = lwp + halo                      # every in-kernel tap slice stays in bounds

    x_bf = jnp.pad(x_flat.astype(jnp.bfloat16),
                   ((0, 0), (0, cp - c_dim), (0, flp - f_len)))
    # Halo'd, overlapping L windows: bounded expansion (~halo/TL, vs kh*kw for a full
    # im2col); keeps every in-kernel slice static and lets BlockSpec stream x.
    x_win = jnp.stack([x_bf[:, :, l * tl: l * tl + tls] for l in range(num_l)],
                      axis=1)                                    # (N, num_l, Cp, TLs)
    w_bf = jnp.pad(w_taps.astype(jnp.bfloat16),
                   ((0, 0), (0, op - o_dim), (0, cp - c_dim)))   # (T, Op, Cp)
    scale_arr = jnp.reshape(scale.astype(jnp.float32), (1,))

    flops = 2 * n_batch * lwp * op * cp * n_taps
    bytes_accessed = x_win.size * 2 + w_bf.size * 2 + n_batch * op * lwp * 4 + 4

    out = pl.pallas_call(
        _make_tap_kernel(tuple(int(d) for d in tap_offsets), tl),
        out_shape=jax.ShapeDtypeStruct((n_batch, op, lwp), jnp.float32),
        grid_spec=pltpu.PrefetchScalarGridSpec(
            num_scalar_prefetch=0,
            grid=(n_batch, num_o, num_l),        # L fastest -> weights stay resident
            in_specs=[
                pl.BlockSpec(memory_space=pltpu.MemorySpace.SMEM),            # scale
                pl.BlockSpec((n_taps, to, cp), lambda b, o, l: (0, o, 0)),    # weights
                pl.BlockSpec((1, 1, cp, tls), lambda b, o, l: (b, l, 0, 0)),  # x window
            ],
            out_specs=pl.BlockSpec((1, to, tl), lambda b, o, l: (b, o, l)),
        ),
        compiler_params=pltpu.CompilerParams(
            dimension_semantics=("parallel", "parallel", "parallel"),
            vmem_limit_bytes=vmem_limit,
        ),
        cost_estimate=pl.CostEstimate(flops=flops, transcendentals=0,
                                      bytes_accessed=bytes_accessed),
    )(scale_arr, w_bf, x_win)
    return out[:, :o_dim, :out_len]


# --------------------------- plain-JAX glue ---------------------------------

def quantize_inputs(x, weight, bits=8):
    n_lev = float(2 ** bits)
    tiny = jnp.float32(1e-30)   # only changes degenerate all-zero cases (ref would NaN)
    # uniform_quantization_x
    x_delta = jnp.maximum(jnp.abs(x.max()).astype(jnp.float32) / n_lev, tiny)
    x_q = jnp.clip(jnp.round(x / x_delta), 0.0, n_lev - 1.0)
    # uniform_quantization_w
    w_delta = jnp.maximum(
        jnp.maximum(jnp.abs(weight.min()), jnp.abs(weight.max())).astype(jnp.float32)
        * 2.0 / n_lev, tiny)
    w_q = jnp.clip(jnp.round(weight / w_delta), -n_lev / 2.0, n_lev / 2.0 - 1.0)
    return x_q, w_q, x_delta * w_delta


def unfold_nchw_klast(x, kh, kw, stride, padding, out_dtype):
    """torch.nn.functional.unfold ordering: (N, C*kh*kw, OH*OW)."""
    n, c, h, w = x.shape
    xp = jnp.pad(x, ((0, 0), (0, 0), (padding, padding), (padding, padding)))
    oh = (h + 2 * padding - kh) // stride + 1
    ow = (w + 2 * padding - kw) // stride + 1
    patches = []
    for i in range(kh):
        for j in range(kw):
            patches.append(xp[:, :,
                              i: i + stride * (oh - 1) + 1: stride,
                              j: j + stride * (ow - 1) + 1: stride])
    p = jnp.stack(patches, axis=2)                     # (N, C, kh*kw, OH, OW)
    return p.reshape(n, c * kh * kw, oh * ow).astype(out_dtype), oh, ow


def systolic_conv2d_forward(x, weight, stride=1, padding=0):
    """Forward of SystolicConv2d (quantize=True, hw_sim=True, bypass=False)."""
    o_dim, c_dim, kh, kw = weight.shape
    n, _, h, w = x.shape
    x_q, w_q, scale = quantize_inputs(x, weight)

    oh = (h + 2 * padding - kh) // stride + 1
    ow = (w + 2 * padding - kw) // stride + 1

    # TODO(synk): the cpy_smt_sa cycle-accurate simulator stats (m.run_int8 cycles,
    # buffer fullness, ALU utilization) have no Pallas equivalent; only its functional
    # output (the integer matmul) is reproduced. The conv bias is never added on the
    # hw_sim path, so it is not added here either.
    if stride == 1:
        # Fused-im2col path: kh*kw shifted matmuls over the flat padded input.
        hp, wp = h + 2 * padding, w + 2 * padding
        x_pad = jnp.pad(x_q.astype(jnp.bfloat16),
                        ((0, 0), (0, 0), (padding, padding), (padding, padding)))
        x_flat = x_pad.reshape(n, c_dim, hp * wp)
        w_taps = jnp.transpose(w_q, (2, 3, 0, 1)).reshape(kh * kw, o_dim, c_dim)
        offsets = tuple(i * wp + j for i in range(kh) for j in range(kw))
        # "Wide rows": compute OH x Wp outputs per row (constant flat offset per tap),
        # then keep the first OW columns of each row (fold is then just a reshape).
        out_wide = systolic_tap_matmul(w_taps, x_flat, scale, offsets, oh * wp)
        out = out_wide.reshape(n, o_dim, oh, wp)[:, :, :, :ow]
    else:
        # Fallback (stride > 1): materialized bf16 im2col + single-tap matmul.
        x_unf, oh, ow = unfold_nchw_klast(x_q, kh, kw, stride, padding, jnp.bfloat16)
        w_mat = w_q.reshape(1, o_dim, c_dim * kh * kw)
        out_unf = systolic_tap_matmul(w_mat, x_unf, scale, (0,), oh * ow)
        out = out_unf.reshape(n, o_dim, oh, ow)
    return out


# --------------------------------- main --------------------------------------

if __name__ == "__main__":
    key = jax.random.PRNGKey(0)
    kx, kw_key = jax.random.split(key)

    # SystolicConv2d(in_channels=4, out_channels=8, kernel_size=3, stride=1, padding=1)
    n, c, h, w = 2, 4, 16, 16
    o, kh, kw = 8, 3, 3
    stride, padding = 1, 1

    x = jax.random.uniform(kx, (n, c, h, w), dtype=jnp.float32)             # activations
    weight = jax.random.normal(kw_key, (o, c, kh, kw), dtype=jnp.float32) * 0.1

    out = systolic_conv2d_forward(x, weight, stride=stride, padding=padding)
    out = jax.block_until_ready(out)
    assert out.shape == (n, o, h, w), out.shape

    # Pure-JAX reference of the same quantized forward (exact integer sums in f32).
    x_q, w_q, scale = quantize_inputs(x, weight)
    ref = jax.lax.conv_general_dilated(
        x_q, w_q, window_strides=(stride, stride),
        padding=[(padding, padding), (padding, padding)],
        dimension_numbers=("NCHW", "OIHW", "NCHW"),
        precision=jax.lax.Precision.HIGHEST) * scale
    assert jnp.allclose(out, ref, rtol=1e-4, atol=1e-4), "mismatch vs reference conv"

    print("KERNEL_OK")
</pallas_src>

<mosaic_0001>
module attributes {stable_mosaic.version = 11 : i64} {
  func.func @kernel(%arg0: i32, %arg1: i32, %arg2: i32, %arg3: memref<1xf32, #tpu.memory_space<smem>>, %arg4: memref<9x8x8xbf16, #tpu.memory_space<vmem>>, %arg5: memref<1x1x8x512xbf16, #tpu.memory_space<vmem>>, %arg6: memref<1x8x384xf32, #tpu.memory_space<vmem>>) attributes {dimension_semantics = [#tpu.dimension_semantics<parallel>, #tpu.dimension_semantics<parallel>, #tpu.dimension_semantics<parallel>], iteration_bounds = array<i64: 2, 1, 1>, scalar_prefetch = 0 : i64, scratch_operands = 0 : i64, tpu.core_type = #tpu.core_type<tc>, window_params = [{transform_indices = @transform_0, window_bounds = array<i64: 1>}, {transform_indices = @transform_1, window_bounds = array<i64: 9, 8, 8>}, {transform_indices = @transform_2, window_bounds = array<i64: 1, 1, 8, 512>}, {transform_indices = @transform_3, window_bounds = array<i64: 1, 8, 384>}]} {
    %c0 = arith.constant 0 : index
    %c0_0 = arith.constant 0 : index
    %c0_1 = arith.constant 0 : index
    %c0_2 = arith.constant 0 : index
    %0 = vector.load %arg5[%c0, %c0_0, %c0_1, %c0_2] : memref<1x1x8x512xbf16, #tpu.memory_space<vmem>>, vector<1x1x8x512xbf16>
    %1 = vector.shape_cast %0 : vector<1x1x8x512xbf16> to vector<8x512xbf16>
    %cst = arith.constant 0.000000e+00 : f32
    %2 = vector.broadcast %cst : f32 to vector<8x384xf32>
    %3 = vector.extract_strided_slice %1 {offsets = [0, 0], sizes = [8, 384], strides = [1, 1]} : vector<8x512xbf16> to vector<8x384xbf16>
    %c0_3 = arith.constant 0 : index
    %c0_4 = arith.constant 0 : index
    %c0_5 = arith.constant 0 : index
    %4 = vector.load %arg4[%c0_3, %c0_4, %c0_5] : memref<9x8x8xbf16, #tpu.memory_space<vmem>>, vector<1x8x8xbf16>
    %5 = vector.shape_cast %4 : vector<1x8x8xbf16> to vector<8x8xbf16>
    %cst_6 = arith.constant dense<0.000000e+00> : vector<8x384xf32>
    %6 = tpu.matmul %5, %3, %cst_6 {dimension_numbers = #tpu.dot_dimension_numbers<[1], [0], [0], [1], [0, 0, 1, 1], [], []>} : vector<8x8xbf16>, vector<8x384xbf16>, vector<8x384xf32> -> vector<8x384xf32>
    %7 = arith.addf %2, %6 : vector<8x384xf32>
    %8 = vector.extract_strided_slice %1 {offsets = [0, 1], sizes = [8, 384], strides = [1, 1]} : vector<8x512xbf16> to vector<8x384xbf16>
    %c1 = arith.constant 1 : index
    %c0_7 = arith.constant 0 : index
    %c0_8 = arith.constant 0 : index
    %9 = vector.load %arg4[%c1, %c0_7, %c0_8] : memref<9x8x8xbf16, #tpu.memory_space<vmem>>, vector<1x8x8xbf16>
    %10 = vector.shape_cast %9 : vector<1x8x8xbf16> to vector<8x8xbf16>
    %cst_9 = arith.constant dense<0.000000e+00> : vector<8x384xf32>
    %11 = tpu.matmul %10, %8, %cst_9 {dimension_numbers = #tpu.dot_dimension_numbers<[1], [0], [0], [1], [0, 0, 1, 1], [], []>} : vector<8x8xbf16>, vector<8x384xbf16>, vector<8x384xf32> -> vector<8x384xf32>
    %12 = arith.addf %7, %11 : vector<8x384xf32>
    %13 = vector.extract_strided_slice %1 {offsets = [0, 2], sizes = [8, 384], strides = [1, 1]} : vector<8x512xbf16> to vector<8x384xbf16>
    %c2 = arith.constant 2 : index
    %c0_10 = arith.constant 0 : index
    %c0_11 = arith.constant 0 : index
    %14 = vector.load %arg4[%c2, %c0_10, %c0_11] : memref<9x8x8xbf16, #tpu.memory_space<vmem>>, vector<1x8x8xbf16>
    %15 = vector.shape_cast %14 : vector<1x8x8xbf16> to vector<8x8xbf16>
    %cst_12 = arith.constant dense<0.000000e+00> : vector<8x384xf32>
    %16 = tpu.matmul %15, %13, %cst_12 {dimension_numbers = #tpu.dot_dimension_numbers<[1], [0], [0], [1], [0, 0, 1, 1], [], []>} : vector<8x8xbf16>, vector<8x384xbf16>, vector<8x384xf32> -> vector<8x384xf32>
    %17 = arith.addf %12, %16 : vector<8x384xf32>
    %18 = vector.extract_strided_slice %1 {offsets = [0, 18], sizes = [8, 384], strides = [1, 1]} : vector<8x512xbf16> to vector<8x384xbf16>
    %c3 = arith.constant 3 : index
    %c0_13 = arith.constant 0 : index
    %c0_14 = arith.constant 0 : index
    %19 = vector.load %arg4[%c3, %c0_13, %c0_14] : memref<9x8x8xbf16, #tpu.memory_space<vmem>>, vector<1x8x8xbf16>
    %20 = vector.shape_cast %19 : vector<1x8x8xbf16> to vector<8x8xbf16>
    %cst_15 = arith.constant dense<0.000000e+00> : vector<8x384xf32>
    %21 = tpu.matmul %20, %18, %cst_15 {dimension_numbers = #tpu.dot_dimension_numbers<[1], [0], [0], [1], [0, 0, 1, 1], [], []>} : vector<8x8xbf16>, vector<8x384xbf16>, vector<8x384xf32> -> vector<8x384xf32>
    %22 = arith.addf %17, %21 : vector<8x384xf32>
    %23 = vector.extract_strided_slice %1 {offsets = [0, 19], sizes = [8, 384], strides = [1, 1]} : vector<8x512xbf16> to vector<8x384xbf16>
    %c4 = arith.constant 4 : index
    %c0_16 = arith.constant 0 : index
    %c0_17 = arith.constant 0 : index
    %24 = vector.load %arg4[%c4, %c0_16, %c0_17] : memref<9x8x8xbf16, #tpu.memory_space<vmem>>, vector<1x8x8xbf16>
    %25 = vector.shape_cast %24 : vector<1x8x8xbf16> to vector<8x8xbf16>
    %cst_18 = arith.constant dense<0.000000e+00> : vector<8x384xf32>
    %26 = tpu.matmul %25, %23, %cst_18 {dimension_numbers = #tpu.dot_dimension_numbers<[1], [0], [0], [1], [0, 0, 1, 1], [], []>} : vector<8x8xbf16>, vector<8x384xbf16>, vector<8x384xf32> -> vector<8x384xf32>
    %27 = arith.addf %22, %26 : vector<8x384xf32>
    %28 = vector.extract_strided_slice %1 {offsets = [0, 20], sizes = [8, 384], strides = [1, 1]} : vector<8x512xbf16> to vector<8x384xbf16>
    %c5 = arith.constant 5 : index
    %c0_19 = arith.constant 0 : index
    %c0_20 = arith.constant 0 : index
    %29 = vector.load %arg4[%c5, %c0_19, %c0_20] : memref<9x8x8xbf16, #tpu.memory_space<vmem>>, vector<1x8x8xbf16>
    %30 = vector.shape_cast %29 : vector<1x8x8xbf16> to vector<8x8xbf16>
    %cst_21 = arith.constant dense<0.000000e+00> : vector<8x384xf32>
    %31 = tpu.matmul %30, %28, %cst_21 {dimension_numbers = #tpu.dot_dimension_numbers<[1], [0], [0], [1], [0, 0, 1, 1], [], []>} : vector<8x8xbf16>, vector<8x384xbf16>, vector<8x384xf32> -> vector<8x384xf32>
    %32 = arith.addf %27, %31 : vector<8x384xf32>
    %33 = vector.extract_strided_slice %1 {offsets = [0, 36], sizes = [8, 384], strides = [1, 1]} : vector<8x512xbf16> to vector<8x384xbf16>
    %c6 = arith.constant 6 : index
    %c0_22 = arith.constant 0 : index
    %c0_23 = arith.constant 0 : index
    %34 = vector.load %arg4[%c6, %c0_22, %c0_23] : memref<9x8x8xbf16, #tpu.memory_space<vmem>>, vector<1x8x8xbf16>
    %35 = vector.shape_cast %34 : vector<1x8x8xbf16> to vector<8x8xbf16>
    %cst_24 = arith.constant dense<0.000000e+00> : vector<8x384xf32>
    %36 = tpu.matmul %35, %33, %cst_24 {dimension_numbers = #tpu.dot_dimension_numbers<[1], [0], [0], [1], [0, 0, 1, 1], [], []>} : vector<8x8xbf16>, vector<8x384xbf16>, vector<8x384xf32> -> vector<8x384xf32>
    %37 = arith.addf %32, %36 : vector<8x384xf32>
    %38 = vector.extract_strided_slice %1 {offsets = [0, 37], sizes = [8, 384], strides = [1, 1]} : vector<8x512xbf16> to vector<8x384xbf16>
    %c7 = arith.constant 7 : index
    %c0_25 = arith.constant 0 : index
    %c0_26 = arith.constant 0 : index
    %39 = vector.load %arg4[%c7, %c0_25, %c0_26] : memref<9x8x8xbf16, #tpu.memory_space<vmem>>, vector<1x8x8xbf16>
    %40 = vector.shape_cast %39 : vector<1x8x8xbf16> to vector<8x8xbf16>
    %cst_27 = arith.constant dense<0.000000e+00> : vector<8x384xf32>
    %41 = tpu.matmul %40, %38, %cst_27 {dimension_numbers = #tpu.dot_dimension_numbers<[1], [0], [0], [1], [0, 0, 1, 1], [], []>} : vector<8x8xbf16>, vector<8x384xbf16>, vector<8x384xf32> -> vector<8x384xf32>
    %42 = arith.addf %37, %41 : vector<8x384xf32>
    %43 = vector.extract_strided_slice %1 {offsets = [0, 38], sizes = [8, 384], strides = [1, 1]} : vector<8x512xbf16> to vector<8x384xbf16>
    %c8 = arith.constant 8 : index
    %c0_28 = arith.constant 0 : index
    %c0_29 = arith.constant 0 : index
    %44 = vector.load %arg4[%c8, %c0_28, %c0_29] : memref<9x8x8xbf16, #tpu.memory_space<vmem>>, vector<1x8x8xbf16>
    %45 = vector.shape_cast %44 : vector<1x8x8xbf16> to vector<8x8xbf16>
    %cst_30 = arith.constant dense<0.000000e+00> : vector<8x384xf32>
    %46 = tpu.matmul %45, %43, %cst_30 {dimension_numbers = #tpu.dot_dimension_numbers<[1], [0], [0], [1], [0, 0, 1, 1], [], []>} : vector<8x8xbf16>, vector<8x384xbf16>, vector<8x384xf32> -> vector<8x384xf32>
    %47 = arith.addf %42, %46 : vector<8x384xf32>
    %c0_31 = arith.constant 0 : index
    %48 = memref.load %arg3[%c0_31] : memref<1xf32, #tpu.memory_space<smem>>
    %49 = vector.broadcast %48 : f32 to vector<8x384xf32>
    %50 = arith.mulf %47, %49 : vector<8x384xf32>
    %c0_32 = arith.constant 0 : index
    %c0_33 = arith.constant 0 : index
    %c0_34 = arith.constant 0 : index
    %51 = vector.load %arg6[%c0_32, %c0_33, %c0_34] : memref<1x8x384xf32, #tpu.memory_space<vmem>>, vector<1x8x384xf32>
    %52 = vector.shape_cast %51 : vector<1x8x384xf32> to vector<8x384xf32>
    %53 = vector.shape_cast %50 : vector<8x384xf32> to vector<1x8x384xf32>
    tpu.vector_store %arg6[%c0_32, %c0_33, %c0_34], %53 {strides = array<i32>} : memref<1x8x384xf32, #tpu.memory_space<vmem>>, vector<1x8x384xf32>,
    return
  }
  func.func @transform_0(%arg0: i32, %arg1: i32, %arg2: i32) -> i32 {
    %c0_i32 = arith.constant 0 : i32
    %c0_i32_0 = arith.constant 0 : i32
    return %c0_i32 : i32
  }
  func.func @transform_1(%arg0: i32, %arg1: i32, %arg2: i32) -> (i32, i32, i32) {
    %c0_i32 = arith.constant 0 : i32
    %c0_i32_0 = arith.constant 0 : i32
    %c0_i32_1 = arith.constant 0 : i32
    return %c0_i32, %arg1, %c0_i32_0 : i32, i32, i32
  }
  func.func @transform_2(%arg0: i32, %arg1: i32, %arg2: i32) -> (i32, i32, i32, i32) {
    %c0_i32 = arith.constant 0 : i32
    %c0_i32_0 = arith.constant 0 : i32
    %c0_i32_1 = arith.constant 0 : i32
    return %arg0, %arg2, %c0_i32, %c0_i32_0 : i32, i32, i32, i32
  }
  func.func @transform_3(%arg0: i32, %arg1: i32, %arg2: i32) -> (i32, i32, i32) {
    %c0_i32 = arith.constant 0 : i32
    return %arg0, %arg1, %arg2 : i32, i32, i32
  }
}

</mosaic_0001>

<bundles_post_ra>
// kernel: tpu_custom_call.1
= control target key start
LH: loop header
LB: loop body
LE: loop exit
PB: predicated region body
PF: predicated region fallthrough
CT: control target
= control target key end

     0   :  { %s1879_s0 = inlined_call_operand.<no memory space> [shape: f32[1], index: 0, kind: input, shape index: {}]   ;;  %s1880_s1 = inlined_call_operand.vmem [shape: bf16[9,8,8], index: 1, kind: input, shape index: {}]   ;;  %s1881_s2 = inlined_call_operand.vmem [shape: bf16[2,1,8,512], index: 2, kind: input, shape index: {}]   ;;  %s1882_s3 = inlined_call_operand.hbm [shape: f32[2,8,384], index: 3, kind: output, shape index: {}]  }
   0x1   :  { %8 = sst [smem:[#allocation2]] %s1879_s0 }
   0x2   :  { %9 = vsyncpa [#allocation4], 0 }
   0x3   :  { %11 = vsyncpa [#allocation4 + $0x1], 0  ;;  %s1645_s14 = smov 0   ;;  %s1647_s15 = smov 0  }
   0x4   :  { %s1649_s16 = smov 0   ;;  %s1651_s17 = smov 0  }
   0x5   :  { %s1653_s18 = smov 0   ;;  %s1655_s19 = smov 0  }
   0x6 LB: > { %s1337_s0 = sadd.s32 4294967295, %s1608_s19   ;;  %s1338_s20 = sadd.s32 4294967294, %s1608_s19   ;;  %s1608_s19 = sphi %s1655_s19, %s17_s19   ;;  %s1604_s18 = sphi %s1653_s18, %s1889_s18   ;;  %s1600_s17 = sphi %s1651_s17, %s1888_s17   ;;  %s1596_s16 = sphi %s1649_s16, %s1887_s16   ;;  %s1592_s15 = sphi %s1647_s15, %s1886_s15   ;;  %s1588_s14 = sphi %s1645_s14, %s1885_s14  }
   0x7   : > { %s36_s21 = sadd.s32 1, %s1604_s18  ;;  %s122_s22 = sadd.s32 1, %s1596_s16 }
   0x8   : > { %p38_p0 = scmp.ge.s32.totalorder %s36_s21, 2  ;;  %p132_p1 = scmp.ne.s32.totalorder %s1596_s16, %s1592_s15 }
   0x9   : > { %p133_p2 = scmp.eq.s32.totalorder %s1337_s0, 1  ;;  %p138_p3 = scmp.ne.s32.totalorder %s1592_s15, %s1588_s14 }
   0xa   : > { %s1891_s21 = smov (%p38_p0, %s36_s21), 0  ;;  %p139_p5 = scmp.eq.s32.totalorder %s1338_s20, 1 }
   0xb   : > { %p1685_p4 = por %p133_p2, %p132_p1  ;;  %s115_s24 = ssub.s32 %s1604_s18, %s1891_s21 }
   0xc   : > { %p1342_p6 = scmp.ge.s32.totalorder %s1608_s19, 1  ;;  %p120_p7 = scmp.eq.s32.totalorder %s115_s24, 0 }
   0xd   : > { %p1692_p8 = por %p139_p5, %p138_p3  ;;  %p179_p9 = scmp.lt.s32.totalorder %s1608_s19, 3 }
   0xe   : > { %s1698_s26 = scalar_select %p120_p7, %s1596_s16, %s122_s22  }
   0xf   : > { %p180_p10 = pnand %p1342_p6, %p179_p9 }
  0x10   : > { %p215_p11 = scmp.lt.s32.totalorder (!%p180_p10), %s1600_s17, 1  ;;  %s1613_s5 = smov (!%p180_p10), 127  }
  0x11   : > { %183 = sbr.rel (%p180_p10) target bundleno = 429 (0x1ad), region = 32  ;;  %s1614_s6 = smov (!%p180_p10), 126  }
  0x12   : > { %s1615_s7 = smov (!%p180_p10), 110   ;;  %s1616_s8 = smov (!%p180_p10), 109  }
  0x13   : > { %s1617_s9 = smov (!%p180_p10), 108   ;;  %s1618_s10 = smov (!%p180_p10), 92  }
  0x14   : > { %s1619_s11 = smov (!%p180_p10), 91   ;;  %s1620_s12 = smov (!%p180_p10), 90  }
  0x15   : > { %s208_s13 = sand.u32 (!%p180_p10), 1, %s1592_s15   ;;  %s1211_s0 = sld [smem:[#allocation2]] (!%p180_p10) }
  0x16   : > { %v1610_v0 = vmov 0.0   ;;  %s216_s27 = scalar_select %p215_p11, %s1600_s17, 1  ;;  %v1611_v1 = vmov 0   ;;  %vm1612_vm0 = vmmov 0   ;;  %vm249_vm1 = vcmask 1039360  }
  0x17   : > { %1406 = vmatprep.subr.bf16.mxu1 %v1610_v0  ;;  %299 = vmatprep.mubr.bf16.mxu0 %v1611_v1  ;;  %vm257_vm2 = vcmask 1043456   ;;  %v1345_v17 = vld [vmem:[%s1880_s1 + $0x4] sm:$0xf]  ;;  %vm253_vm3 = vcmask 64512   ;;  %vm451_vm4 = vcmask 1031168   ;;  %vm561_vm5 = vcmask 900096  }
  0x18   : > { %1408 = vmatprep.mubr.msk.bf16.mxu1 %vm1612_vm0, %v1610_v0  ;;  %s1387_s28 = sshll.u32 %s216_s27, 4  ;;  %v228_v27 = vld [vmem:[%s1880_s1] sm:$0xf]  ;;  %v1356_v37 = vld [vmem:[%s1880_s1 + $0x8] sm:$0xf]  ;;  %vm671_vm6 = vcmask 891904  }
  0x19   : > { %s223_s4 = scalar_lea.vmem %s1881_s2, %s1387_s28  ;;  %v1360_v47 = vld [vmem:[%s1880_s1 + $0xc] sm:$0xf]  ;;  %vm781_vm7 = vcmask 883712   ;;  %v1364_v57 = vld [vmem:[%s1880_s1 + $0x10] sm:$0xf]  ;;  %vm891_vm8 = vcmask 752640  }
  0x1a   : > { %v227_v2 = vld [vmem:[%s223_s4 + $0x8] sm:$0xff]  ;;  %v226_v3 = vld [vmem:[%s223_s4] sm:$0xff]  ;;  %vm1001_vm9 = vcmask 744448   ;;  %vm1111_vm10 = vcmask 736256   ;;  %s1460_s20 = smul.u32 24, %s208_s13 }
  0x1b   : > { %v1709_v4 = vcombine.low %v227_v2, %v227_v2  ;;  %v1346_v5 = vcombine.low %v226_v3, %v226_v3  ;;  %v1349_v6 = vcombine.high %v227_v2, %v227_v2  ;;  %v1347_v7 = vcombine.high %v226_v3, %v226_v3  ;;  %s1461_s22 = smul.u32 384, %s1600_s17  ;;  %s1220_s17 = scalar_lea.sflag [#allocation4], %s208_s13 }
  0x1c   : > { %s210_s24 = scalar_lea.vmem [#allocation3], %s1460_s20 }
  0x1d   : > { %245 = vrot.lane.b32.xlu1 %v1709_v4, %s1613_s5  ;;  %241 = vrot.lane.b32.xlu0 %v1346_v5, %s1613_s5  ;;  %v352_v19 = vsel %vm257_vm2, %v1346_v5, 0  ;;  %v358_v21 = vsel %vm257_vm2, %v1709_v4, 0  ;;  %s1238_s27 = sshll.u32 %s210_s24, 4  ;;  %s1831_s30 = scalar_lea.hbm %s1882_s3, %s1461_s22  ;;  %s1833_s27 = int_to_ptr.vmem [resolvable:$true] %s1238_s27 }
  0x1e   : > { %s1532_s4 = scalar_lea.vmem %s1833_s27, 384 }
  0x1f   : > { %p1533_p12 = scmp.ne.s32.totalorder %s1833_s27, %s1532_s4 }
  0x21   : > { %247 = vrot.lane.b32.xlu1 %v1349_v6, %s1613_s5  ;;  %243 = vrot.lane.b32.xlu0 %v1347_v7, %s1613_s5  ;;  %p1534_p13 = pnand %p1533_p12, %p1685_p4  ;;  %s1621_s5 = smov [#allocation3]  }
  0x23   : > { %p1535_p0 = pneg %p1534_p13 }
  0x25   : > { %443 = vrot.lane.b32.xlu0 %v1346_v5, %s1614_s6  ;;  %445 = vrot.lane.b32.xlu1 %v1347_v7, %s1614_s6 }
  0x29   : > { %447 = vrot.lane.b32.xlu0 %v1709_v4, %s1614_s6  ;;  %449 = vrot.lane.b32.xlu1 %v1349_v6, %s1614_s6  ;;  %s1536_s6 = sshll.u32 %s1621_s5, 4  ;;  %s1537_s6 = int_to_ptr.vmem [resolvable:$false] %s1536_s6 }
  0x2a   : > { %p1539_p1 = scmp.lt.s32.totalorder %s1833_s27, %s1537_s6 }
  0x2d   : > { %553 = vrot.lane.b32.xlu0 %v1346_v5, %s1615_s7  ;;  %555 = vrot.lane.b32.xlu1 %v1347_v7, %s1615_s7 }
  0x31   : > { %557 = vrot.lane.b32.xlu0 %v1709_v4, %s1615_s7  ;;  %559 = vrot.lane.b32.xlu1 %v1349_v6, %s1615_s7  ;;  %s1538_s7 = scalar_lea.vmem %s1537_s6, 768 }
  0x32   : > { %p1540_p2 = scmp.lt.s32.totalorder %s1538_s7, %s1532_s4 }
  0x34   : > { %p1541_p3 = por %p1540_p2, %p1539_p1 }
  0x35   : > { %663 = vrot.lane.b32.xlu0 %v1346_v5, %s1616_s8  ;;  %665 = vrot.lane.b32.xlu1 %v1347_v7, %s1616_s8 }
  0x36   : > { %p1542_p5 = pnand %p1541_p3, %p1535_p0 }
  0x39   : > { %667 = vrot.lane.b32.xlu0 %v1709_v4, %s1616_s8  ;;  %669 = vrot.lane.b32.xlu1 %v1349_v6, %s1616_s8 }
  0x3d   : > { %773 = vrot.lane.b32.xlu0 %v1346_v5, %s1617_s9  ;;  %775 = vrot.lane.b32.xlu1 %v1347_v7, %s1617_s9 }
  0x41   : > { %777 = vrot.lane.b32.xlu0 %v1709_v4, %s1617_s9  ;;  %779 = vrot.lane.b32.xlu1 %v1349_v6, %s1617_s9 }
  0x45   : > { %883 = vrot.lane.b32.xlu0 %v1346_v5, %s1618_s10  ;;  %885 = vrot.lane.b32.xlu1 %v1347_v7, %s1618_s10 }
  0x49   : > { %887 = vrot.lane.b32.xlu0 %v1709_v4, %s1618_s10  ;;  %889 = vrot.lane.b32.xlu1 %v1349_v6, %s1618_s10 }
  0x4d   : > { %993 = vrot.lane.b32.xlu0 %v1346_v5, %s1619_s11  ;;  %995 = vrot.lane.b32.xlu1 %v1347_v7, %s1619_s11 }
  0x51   : > { %997 = vrot.lane.b32.xlu0 %v1709_v4, %s1619_s11  ;;  %999 = vrot.lane.b32.xlu1 %v1349_v6, %s1619_s11 }
  0x55   : > { %1103 = vrot.lane.b32.xlu0 %v1346_v5, %s1620_s12  ;;  %1105 = vrot.lane.b32.xlu1 %v1347_v7, %s1620_s12  ;;  %v1368_v5 = vld [vmem:[%s1880_s1 + $0x14] sm:$0xf] }
  0x59   : > { %1107 = vrot.lane.b32.xlu0 %v1709_v4, %s1620_s12  ;;  %1109 = vrot.lane.b32.xlu1 %v1349_v6, %s1620_s12 }
  0x8f   : > { %v246_v8 = vpop.permute.xlu1 %245  ;;  %v242_v9 = vpop.permute.xlu0 %241 }
  0x93   : > { %v248_v10 = vpop.permute.xlu1 %247  ;;  %v244_v11 = vpop.permute.xlu0 %243 }
  0x94   : > { %v251_v12 = vsel %vm249_vm1, %v244_v11, %v246_v8  ;;  %v250_v13 = vsel %vm249_vm1, %v242_v9, %v244_v11  ;;  %v252_v14 = vsel %vm249_vm1, %v246_v8, %v248_v10 }
  0x95   : > { %1350 = vmatprep.subr.msk.bf16.mxu0 %vm257_vm2, %v251_v12  ;;  %v259_v15 = vsel %vm257_vm2, %v250_v13, 0  ;;  %v265_v16 = vsel %vm257_vm2, %v252_v14, 0 }
  0x96   : > { %282 = vmatpush1.bf16.msra.mxu0 %v259_v15  ;;  %1407 = vmatpush3.bf16.msra.mxu1 %v265_v16  ;;  %v1372_v15 = vld [vmem:[%s1880_s1 + $0x18] sm:$0xf] }
  0x97   : > { %1353 = vmatprep.subr.msk.bf16.mxu0 %vm257_vm2, %v1347_v7  ;;  %v444_v18 = vpop.permute.xlu0 %443  ;;  %1412 = vmatprep.subr.bf16.mxu1 %v1610_v0  ;;  %v446_v20 = vpop.permute.xlu1 %445 }
  0x98   : > { %v452_v24 = vsel %vm451_vm4, %v444_v18, %v446_v20 }
  0x99   : > { %1351 = vmatmul.mubr.msk.bf16.vlgmr.msra.gmra.mxu0 %vm253_vm3, %v1345_v17  ;;  %1409 = vmatmul.mubr.msk.bf16.vlgmr.msra.gmra.mxu1 %vm253_vm3, %v1345_v17  ;;  %v459_v28 = vsel %vm257_vm2, %v452_v24, 0 }
  0x9a   : > { %375 = vmatpush1.bf16.msra.mxu0 %v352_v19  ;;  %1413 = vmatpush3.bf16.msra.mxu1 %v358_v21 }
  0x9b   : > { %v448_v22 = vpop.permute.xlu0 %447  ;;  %v450_v23 = vpop.permute.xlu1 %449  ;;  %392 = vmatprep.mubr.bf16.mxu0 %v1611_v1  ;;  %1414 = vmatprep.mubr.msk.bf16.mxu1 %vm1612_vm0, %v1610_v0 }
  0x9c   : > { %v453_v25 = vsel %vm451_vm4, %v446_v20, %v448_v22  ;;  %v454_v26 = vsel %vm451_vm4, %v448_v22, %v450_v23  ;;  %1418 = vmatprep.subr.bf16.mxu1 %v1610_v0 }
  0x9d   : > { %1357 = vmatprep.subr.msk.bf16.mxu0 %vm257_vm2, %v453_v25  ;;  %v465_v29 = vsel %vm257_vm2, %v454_v26, 0  ;;  %v1376_v25 = vld [vmem:[%s1880_s1 + $0x1c] sm:$0xf] }
  0x9f   : > { %v554_v30 = vpop.permute.xlu0 %553  ;;  %v556_v31 = vpop.permute.xlu1 %555 }
  0xa0   : > { %v562_v34 = vsel %vm561_vm5, %v554_v30, %v556_v31 }
  0xa1   : > { %1415 = vmatmul.mubr.msk.bf16.vlgmr.msra.gmra.mxu1 %vm253_vm3, %v228_v27  ;;  %1354 = vmatmul.mubr.msk.bf16.vlgmr.msra.gmra.mxu0 %vm253_vm3, %v228_v27  ;;  %v569_v38 = vsel %vm257_vm2, %v562_v34, 0 }
  0xa2   : > { %482 = vmatpush1.bf16.msra.mxu0 %v459_v28  ;;  %1419 = vmatpush3.bf16.msra.mxu1 %v465_v29  ;;  %v1380_v28 = vld [vmem:[%s1880_s1 + $0x20] sm:$0xf] }
  0xa3   : > { %v558_v32 = vpop.permute.xlu0 %557  ;;  %v560_v33 = vpop.permute.xlu1 %559  ;;  %499 = vmatprep.mubr.bf16.mxu0 %v1611_v1  ;;  %1420 = vmatprep.mubr.msk.bf16.mxu1 %vm1612_vm0, %v1610_v0 }
  0xa4   : > { %v563_v35 = vsel %vm561_vm5, %v556_v31, %v558_v32  ;;  %v564_v36 = vsel %vm561_vm5, %v558_v32, %v560_v33  ;;  %1424 = vmatprep.subr.bf16.mxu1 %v1610_v0 }
  0xa5   : > { %1361 = vmatprep.subr.msk.bf16.mxu0 %vm257_vm2, %v563_v35  ;;  %v575_v39 = vsel %vm257_vm2, %v564_v36, 0 }
  0xa7   : > { %v664_v40 = vpop.permute.xlu0 %663  ;;  %v666_v41 = vpop.permute.xlu1 %665 }
  0xa8   : > { %v672_v44 = vsel %vm671_vm6, %v664_v40, %v666_v41 }
  0xa9   : > { %1421 = vmatmul.mubr.msk.bf16.vlgmr.msra.gmra.mxu1 %vm253_vm3, %v1356_v37  ;;  %1358 = vmatmul.mubr.msk.bf16.vlgmr.msra.gmra.mxu0 %vm253_vm3, %v1356_v37  ;;  %v679_v48 = vsel %vm257_vm2, %v672_v44, 0 }
  0xaa   : > { %592 = vmatpush1.bf16.msra.mxu0 %v569_v38  ;;  %1425 = vmatpush3.bf16.msra.mxu1 %v575_v39 }
  0xab   : > { %v668_v42 = vpop.permute.xlu0 %667  ;;  %v670_v43 = vpop.permute.xlu1 %669  ;;  %609 = vmatprep.mubr.bf16.mxu0 %v1611_v1  ;;  %1426 = vmatprep.mubr.msk.bf16.mxu1 %vm1612_vm0, %v1610_v0 }
  0xac   : > { %v673_v45 = vsel %vm671_vm6, %v666_v41, %v668_v42  ;;  %v674_v46 = vsel %vm671_vm6, %v668_v42, %v670_v43  ;;  %1430 = vmatprep.subr.bf16.mxu1 %v1610_v0 }
  0xad   : > { %1365 = vmatprep.subr.msk.bf16.mxu0 %vm257_vm2, %v673_v45  ;;  %v685_v49 = vsel %vm257_vm2, %v674_v46, 0 }
  0xaf   : > { %v774_v50 = vpop.permute.xlu0 %773  ;;  %v776_v51 = vpop.permute.xlu1 %775 }
  0xb0   : > { %v782_v54 = vsel %vm781_vm7, %v774_v50, %v776_v51 }
  0xb1   : > { %1427 = vmatmul.mubr.msk.bf16.vlgmr.msra.gmra.mxu1 %vm253_vm3, %v1360_v47  ;;  %1362 = vmatmul.mubr.msk.bf16.vlgmr.msra.gmra.mxu0 %vm253_vm3, %v1360_v47  ;;  %v789_v58 = vsel %vm257_vm2, %v782_v54, 0 }
  0xb2   : > { %702 = vmatpush1.bf16.msra.mxu0 %v679_v48  ;;  %1431 = vmatpush3.bf16.msra.mxu1 %v685_v49 }
  0xb3   : > { %v778_v52 = vpop.permute.xlu0 %777  ;;  %v780_v53 = vpop.permute.xlu1 %779  ;;  %719 = vmatprep.mubr.bf16.mxu0 %v1611_v1  ;;  %1432 = vmatprep.mubr.msk.bf16.mxu1 %vm1612_vm0, %v1610_v0 }
  0xb4   : > { %v783_v55 = vsel %vm781_vm7, %v776_v51, %v778_v52  ;;  %v784_v56 = vsel %vm781_vm7, %v778_v52, %v780_v53  ;;  %1436 = vmatprep.subr.bf16.mxu1 %v1610_v0 }
  0xb5   : > { %1369 = vmatprep.subr.msk.bf16.mxu0 %vm257_vm2, %v783_v55  ;;  %v795_v59 = vsel %vm257_vm2, %v784_v56, 0 }
  0xb7   : > { %v884_v60 = vpop.permute.xlu0 %883  ;;  %v886_v61 = vpop.permute.xlu1 %885 }
  0xb8   : > { %v892_v2 = vsel %vm891_vm8, %v884_v60, %v886_v61 }
  0xb9   : > { %1433 = vmatmul.mubr.msk.bf16.vlgmr.msra.gmra.mxu1 %vm253_vm3, %v1364_v57  ;;  %1366 = vmatmul.mubr.msk.bf16.vlgmr.msra.gmra.mxu0 %vm253_vm3, %v1364_v57  ;;  %v899_v6 = vsel %vm257_vm2, %v892_v2, 0 }
  0xba   : > { %812 = vmatpush1.bf16.msra.mxu0 %v789_v58  ;;  %1437 = vmatpush3.bf16.msra.mxu1 %v795_v59 }
  0xbb   : > { %v888_v62 = vpop.permute.xlu0 %887  ;;  %v890_v63 = vpop.permute.xlu1 %889  ;;  %829 = vmatprep.mubr.bf16.mxu0 %v1611_v1  ;;  %1438 = vmatprep.mubr.msk.bf16.mxu1 %vm1612_vm0, %v1610_v0 }
  0xbc   : > { %v893_v3 = vsel %vm891_vm8, %v886_v61, %v888_v62  ;;  %v894_v4 = vsel %vm891_vm8, %v888_v62, %v890_v63  ;;  %1442 = vmatprep.subr.bf16.mxu1 %v1610_v0 }
  0xbd   : > { %1373 = vmatprep.subr.msk.bf16.mxu0 %vm257_vm2, %v893_v3  ;;  %v905_v7 = vsel %vm257_vm2, %v894_v4, 0 }
  0xbf   : > { %v994_v8 = vpop.permute.xlu0 %993  ;;  %v996_v9 = vpop.permute.xlu1 %995 }
  0xc0   : > { %v1002_v12 = vsel %vm1001_vm9, %v994_v8, %v996_v9 }
  0xc1   : > { %1439 = vmatmul.mubr.msk.bf16.vlgmr.msra.gmra.mxu1 %vm253_vm3, %v1368_v5  ;;  %1370 = vmatmul.mubr.msk.bf16.vlgmr.msra.gmra.mxu0 %vm253_vm3, %v1368_v5  ;;  %v1009_v16 = vsel %vm257_vm2, %v1002_v12, 0 }
  0xc2   : > { %922 = vmatpush1.bf16.msra.mxu0 %v899_v6  ;;  %1443 = vmatpush3.bf16.msra.mxu1 %v905_v7 }
  0xc3   : > { %v998_v10 = vpop.permute.xlu0 %997  ;;  %v1000_v11 = vpop.permute.xlu1 %999  ;;  %939 = vmatprep.mubr.bf16.mxu0 %v1611_v1  ;;  %1444 = vmatprep.mubr.msk.bf16.mxu1 %vm1612_vm0, %v1610_v0 }
  0xc4   : > { %v1003_v13 = vsel %vm1001_vm9, %v996_v9, %v998_v10  ;;  %v1004_v14 = vsel %vm1001_vm9, %v998_v10, %v1000_v11  ;;  %1448 = vmatprep.subr.bf16.mxu1 %v1610_v0 }
  0xc5   : > { %1377 = vmatprep.subr.msk.bf16.mxu0 %vm257_vm2, %v1003_v13  ;;  %v1015_v17 = vsel %vm257_vm2, %v1004_v14, 0 }
  0xc7   : > { %v1104_v18 = vpop.permute.xlu0 %1103  ;;  %v1106_v19 = vpop.permute.xlu1 %1105 }
  0xc8   : > { %v1112_v22 = vsel %vm1111_vm10, %v1104_v18, %v1106_v19 }
  0xc9   : > { %1445 = vmatmul.mubr.msk.bf16.vlgmr.msra.gmra.mxu1 %vm253_vm3, %v1372_v15  ;;  %1374 = vmatmul.mubr.msk.bf16.vlgmr.msra.gmra.mxu0 %vm253_vm3, %v1372_v15  ;;  %v1119_v26 = vsel %vm257_vm2, %v1112_v22, 0 }
  0xca   : > { %1032 = vmatpush1.bf16.msra.mxu0 %v1009_v16  ;;  %1449 = vmatpush3.bf16.msra.mxu1 %v1015_v17 }
  0xcb   : > { %v1108_v20 = vpop.permute.xlu0 %1107  ;;  %v1110_v21 = vpop.permute.xlu1 %1109  ;;  %1049 = vmatprep.mubr.bf16.mxu0 %v1611_v1  ;;  %1450 = vmatprep.mubr.msk.bf16.mxu1 %vm1612_vm0, %v1610_v0 }
  0xcc   : > { %v1113_v23 = vsel %vm1111_vm10, %v1106_v19, %v1108_v20  ;;  %v1114_v24 = vsel %vm1111_vm10, %v1108_v20, %v1110_v21  ;;  %1454 = vmatprep.subr.bf16.mxu1 %v1610_v0 }
  0xcd   : > { %1381 = vmatprep.subr.msk.bf16.mxu0 %vm257_vm2, %v1113_v23  ;;  %v1125_v27 = vsel %vm257_vm2, %v1114_v24, 0 }
  0xd1   : > { %1378 = vmatmul.mubr.msk.bf16.vlgmr.msra.gmra.mxu0 %vm253_vm3, %v1376_v25  ;;  %1451 = vmatmul.mubr.msk.bf16.vlgmr.msra.gmra.mxu1 %vm253_vm3, %v1376_v25 }
  0xd2   : > { %1142 = vmatpush1.bf16.msra.mxu0 %v1119_v26  ;;  %1455 = vmatpush3.bf16.msra.mxu1 %v1125_v27 }
  0xd3   : > { %1159 = vmatprep.mubr.bf16.mxu0 %v1611_v1  ;;  %1456 = vmatprep.mubr.msk.bf16.mxu1 %vm1612_vm0, %v1610_v0 }
  0xd9   : > { %1382 = vmatmul.mubr.msk.bf16.vlgmr.msra.gmra.mxu0 %vm253_vm3, %v1380_v28  ;;  %1457 = vmatmul.mubr.msk.bf16.vlgmr.msra.gmra.mxu1 %vm253_vm3, %v1380_v28 }
 0x159   : > { %v301_v29 = vpop.f32.mrf.mxu0  ;;  %v342_v30 = vpop.f32.mrf.mxu1 }
 0x15b   : > { %v303_v31 = vpop.f32.mrf.mxu0  ;;  %v1410_v32 = vpop.f32.mrf.mxu1 }
 0x15d   : > { %v305_v33 = vpop.f32.mrf.mxu0  ;;  %v345_v34 = vpop.f32.mrf.mxu1 }
 0x15f   : > { %v306_v35 = vpop.f32.mrf.mxu0  ;;  %v1411_v36 = vpop.f32.mrf.mxu1 }
 0x161   : > { %v394_v1 = vpop.f32.mrf.mxu0  ;;  %v435_v37 = vpop.f32.mrf.mxu1 }
 0x162   : > { %v395_v17 = vadd.f32 %v394_v1, %v301_v29  ;;  %v436_v18 = vadd.f32 %v435_v37, %v342_v30 }
 0x163   : > { %v396_v38 = vpop.f32.mrf.mxu0  ;;  %v1416_v0 = vpop.f32.mrf.mxu1 }
 0x164   : > { %v397_v21 = vadd.f32 %v396_v38, %v303_v31 }
 0x165   : > { %v398_v39 = vpop.f32.mrf.mxu0  ;;  %v438_v40 = vpop.f32.mrf.mxu1 }
 0x167   : > { %v399_v41 = vpop.f32.mrf.mxu0  ;;  %v1417_v42 = vpop.f32.mrf.mxu1 }
 0x169   : > { %v501_v43 = vpop.f32.mrf.mxu0  ;;  %v542_v44 = vpop.f32.mrf.mxu1 }
 0x16a   : > { %v548_v22 = vadd.f32 %v501_v43, %v395_v17  ;;  %v550_v23 = vadd.f32 %v542_v44, %v436_v18 }
 0x16b   : > { %v503_v45 = vpop.f32.mrf.mxu0  ;;  %v1422_v46 = vpop.f32.mrf.mxu1 }
 0x16c   : > { %v549_v26 = vadd.f32 %v503_v45, %v397_v21 }
 0x16d   : > { %v505_v47 = vpop.f32.mrf.mxu0  ;;  %v545_v48 = vpop.f32.mrf.mxu1 }
 0x16e   : > { %v1212_v48 = vstv %s1211_s0 }
 0x16f   : > { %v506_v49 = vpop.f32.mrf.mxu0  ;;  %v1423_v50 = vpop.f32.mrf.mxu1 }
 0x171   : > { %v611_v51 = vpop.f32.mrf.mxu0  ;;  %v652_v52 = vpop.f32.mrf.mxu1 }
 0x172   : > { %v658_v27 = vadd.f32 %v611_v51, %v548_v22  ;;  %v660_v28 = vadd.f32 %v652_v52, %v550_v23 }
 0x173   : > { %v613_v53 = vpop.f32.mrf.mxu0  ;;  %v1428_v54 = vpop.f32.mrf.mxu1 }
 0x174   : > { %v659_v34 = vadd.f32 %v613_v53, %v549_v26 }
 0x175   : > { %v615_v55 = vpop.f32.mrf.mxu0  ;;  %v655_v56 = vpop.f32.mrf.mxu1 }
 0x177   : > { %v616_v57 = vpop.f32.mrf.mxu0  ;;  %v1429_v58 = vpop.f32.mrf.mxu1 }
 0x179   : > { %v721_v59 = vpop.f32.mrf.mxu0  ;;  %v762_v60 = vpop.f32.mrf.mxu1 }
 0x17a   : > { %v768_v35 = vadd.f32 %v721_v59, %v658_v27  ;;  %v770_v36 = vadd.f32 %v762_v60, %v660_v28 }
 0x17b   : > { %v723_v61 = vpop.f32.mrf.mxu0  ;;  %v1434_v62 = vpop.f32.mrf.mxu1 }
 0x17c   : > { %v769_v1 = vadd.f32 %v723_v61, %v659_v34 }
 0x17d   : > { %v725_v63 = vpop.f32.mrf.mxu0  ;;  %v765_v2 = vpop.f32.mrf.mxu1 }
 0x17f   : > { %v726_v3 = vpop.f32.mrf.mxu0  ;;  %v1435_v4 = vpop.f32.mrf.mxu1 }
 0x181   : > { %v831_v5 = vpop.f32.mrf.mxu0  ;;  %v872_v6 = vpop.f32.mrf.mxu1 }
 0x182   : > { %v878_v37 = vadd.f32 %v831_v5, %v768_v35  ;;  %v880_v31 = vadd.f32 %v872_v6, %v770_v36 }
 0x183   : > { %v833_v7 = vpop.f32.mrf.mxu0  ;;  %v1440_v8 = vpop.f32.mrf.mxu1 }
 0x184   : > { %v879_v39 = vadd.f32 %v833_v7, %v769_v1 }
 0x185   : > { %v835_v9 = vpop.f32.mrf.mxu0  ;;  %v875_v10 = vpop.f32.mrf.mxu1 }
 0x187   : > { %v836_v11 = vpop.f32.mrf.mxu0  ;;  %v1441_v12 = vpop.f32.mrf.mxu1 }
 0x189   : > { %v941_v13 = vpop.f32.mrf.mxu0  ;;  %v982_v14 = vpop.f32.mrf.mxu1 }
 0x18a   : > { %v988_v40 = vadd.f32 %v941_v13, %v878_v37  ;;  %v990_v41 = vadd.f32 %v982_v14, %v880_v31 }
 0x18b   : > { %v943_v15 = vpop.f32.mrf.mxu0  ;;  %v1446_v16 = vpop.f32.mrf.mxu1 }
 0x18c   : > { %v989_v44 = vadd.f32 %v943_v15, %v879_v39 }
 0x18d   : > { %v945_v19 = vpop.f32.mrf.mxu0  ;;  %v985_v20 = vpop.f32.mrf.mxu1 }
 0x18f   : > { %v946_v24 = vpop.f32.mrf.mxu0  ;;  %v1447_v25 = vpop.f32.mrf.mxu1 }
 0x191   : > { %v1051_v32 = vpop.f32.mrf.mxu0  ;;  %v1092_v33 = vpop.f32.mrf.mxu1 }
 0x192   : > { %v1098_v45 = vadd.f32 %v1051_v32, %v988_v40  ;;  %v1100_v46 = vadd.f32 %v1092_v33, %v990_v41 }
 0x193   : > { %v1053_v29 = vpop.f32.mrf.mxu0  ;;  %v1452_v30 = vpop.f32.mrf.mxu1 }
 0x194   : > { %v1099_v50 = vadd.f32 %v1053_v29, %v989_v44 }
 0x195   : > { %v1055_v38 = vpop.f32.mrf.mxu0  ;;  %v1095_v0 = vpop.f32.mrf.mxu1 }
 0x197   : > { %v1056_v42 = vpop.f32.mrf.mxu0  ;;  %v1453_v43 = vpop.f32.mrf.mxu1 }
 0x199   : > { %v1161_v47 = vpop.f32.mrf.mxu0  ;;  %v1202_v49 = vpop.f32.mrf.mxu1 }
 0x19a   : > { %v1208_v51 = vadd.f32 %v1161_v47, %v1098_v45  ;;  %v1210_v52 = vadd.f32 %v1202_v49, %v1100_v46 }
 0x19b   : > { %v1163_v53 = vpop.f32.mrf.mxu0  ;;  %v1458_v54 = vpop.f32.mrf.mxu1 }
 0x19c   : > { %v1213_v55 = vmul.f32 %v1212_v48, %v1208_v51  ;;  %v1215_v56 = vmul.f32 %v1212_v48, %v1210_v52  ;;  %v1209_v57 = vadd.f32 %v1163_v53, %v1099_v50 }
 0x19d   : > { %v1165_v58 = vpop.f32.mrf.mxu0  ;;  %v1205_v59 = vpop.f32.mrf.mxu1 }
 0x19e   : > { %1216 = vst [vmem:[%s210_s24] sm:$0xff] %v1213_v55  ;;  %1218 = vst [vmem:[%s210_s24 + $0x10] sm:$0xff] %v1215_v56  ;;  %v1214_v60 = vmul.f32 %v1212_v48, %v1209_v57 }
 0x19f   : > { %v1166_v61 = vpop.f32.mrf.mxu0  ;;  %v1459_v62 = vpop.f32.mrf.mxu1 }
 0x1a0   : > { %1217 = vst [vmem:[%s210_s24 + $0x8] sm:$0xff] %v1214_v60 }
 0x1a1   : > { %1545 = shalt.err (!%p1542_p5)
}
 0x1a2   : > { %s1546_s8 = scalar_lea.hbm %s1831_s30, 384  ;;  %s1550_s11 = scalar_lea.hbm %s1882_s3, 768 }
 0x1a3   : > { %p1547_p6 = scmp.ne.s32.totalorder %s1831_s30, %s1546_s8  ;;  %p1551_p10 = scmp.lt.s32.totalorder %s1831_s30, %s1882_s3 }
 0x1a4   : > { %p1552_p11 = scmp.lt.s32.totalorder %s1550_s11, %s1546_s8 }
 0x1a5   : > { %p1548_p7 = pnand %p1547_p6, %p1685_p4 }
 0x1a6   : > { %p1553_p12 = por %p1552_p11, %p1551_p10 }
 0x1a7   : > { %p1549_p9 = pneg %p1548_p7 }
 0x1a9   : > { %p1554_p13 = pnand %p1553_p12, %p1549_p9 }
 0x1ab   : > { %1557 = shalt.err (!%p1554_p13)
}
 0x1ac   : > { %1462 = dma.vmem_to_hbm [thread:$0]  (%p1685_p4), %s1833_s27, 384, %s1831_s30, %s1220_s17  }
 0x1ad PF: > { %p1468_p0 = scmp.ge.s32.totalorder %s1608_s19, 2  ;;  %s1250_s0 = sand.u32 1, %s1588_s14  }
 0x1ae   : > { %s1251_s20 = scalar_lea.sflag [#allocation4], %s1250_s0 }
 0x1af   : > { %p1465_p1 = pnand %p1468_p0, %p1692_p8 }
 0x1b1   : > { %p1466_p2 = pneg %p1465_p1 }
 0x1b3   : > { %1583 = dma.done.wait (%p1466_p2), %s1251_s20, 384  }
 0x1b4   : > { %1585 = vsyncadd (%p1466_p2), %s1251_s20, 4294966912  ;;  %s17_s19 = sadd.s32 1, %s1608_s19   ;;  %s1885_s14 = smov %s1592_s15 }
 0x1b5   : > { %p14_p3 = scmp.ge.s32.totalorder %s17_s19, 4   ;;  %s1886_s15 = smov %s1596_s16 }
 0x1b6   : > { %s1887_s16 = smov %s1698_s26  ;;  %s1888_s17 = smov %s1604_s18 }
 0x1b7   : > { %s1889_s18 = smov %s1891_s21  ;;  %16 = sbr.rel (!%p14_p3) target bundleno = 6 (0x6), region = 78 }
 0x1bc   :  { %1256 = vsyncpa [#allocation4], 1 }
 0x1bd   :  { %1258 = vsyncpa [#allocation4 + $0x1], 1 }

</bundles_post_ra>
